<compile_context>
chip_gen: v6e
topology: v6e:2x2x1
jax: 0.10.0
libtpu: 0.0.40
codegen_flags: <defaults>
</compile_context>

<pallas_src>
import functools

import jax
import jax.numpy as jnp
from jax.experimental import pallas as pl
from jax.experimental.pallas import tpu as pltpu


_LANE = 128   # lane width (last dim)
_SUB = 8      # sublane granularity (second-to-last dim)


def _round_up(n: int, m: int) -> int:
    return ((n + m - 1) // m) * m


def _pad2(x, rows: int, cols: int):
    pr, pc = rows - x.shape[0], cols - x.shape[1]
    if pr == 0 and pc == 0:
        return x
    return jnp.pad(x, ((0, pr), (0, pc)))


def _policy_kernel(x_ref, w1_ref, b1_ref, w2_ref, b2_ref, wm_ref, bm_ref,
                   mean_ref):
    """Fused MLP: relu(x@W1+b1) -> relu(.@W2+b2) -> .@Wm+bm (mean only)."""
    x = x_ref[...].astype(jnp.bfloat16)                          # [TB, S] bf16
    h1 = jnp.dot(x, w1_ref[...], preferred_element_type=jnp.float32)
    h1 = jnp.maximum(h1 + b1_ref[...], 0.0)                      # f32 bias+relu
    h1 = h1.astype(jnp.bfloat16)
    h2 = jnp.dot(h1, w2_ref[...], preferred_element_type=jnp.float32)
    h2 = jnp.maximum(h2 + b2_ref[...], 0.0)
    h2 = h2.astype(jnp.bfloat16)
    mean = jnp.dot(h2, wm_ref[...], preferred_element_type=jnp.float32)
    mean_ref[...] = (mean + bm_ref[...]).astype(mean_ref.dtype)  # [TB, A_p]


@functools.partial(jax.jit, static_argnames=("block_b", "mean_dtype"))
def policy_forward(states, params, *, block_b: int = 1024,
                   mean_dtype=jnp.float32):
    """Returns (mean, std) of the Gaussian policy.

    mean is computed in one lane-dense, batch-tiled Pallas kernel; std does not
    depend on `states`, so it is a single tiny exp + broadcast in the wrapper.
    """
    w1, b1, w2, b2, wm, bm, log_std = (
        params["w1"], params["b1"], params["w2"], params["b2"],
        params["wm"], params["bm"], params["log_std"],
    )
    B, S = states.shape
    H = w1.shape[1]
    A = wm.shape[1]

    # Only the hidden / action widths are lane-padded (tiny, one-time weight
    # pads).  The states keep their real last dim S.
    H_p = _round_up(H, _LANE)
    A_p = _round_up(A, _LANE)

    # Adaptive batch tile: target block_b rows/step, keep >= 2 grid steps when
    # the batch is big enough (v7x megacore), keep batch padding <= 1 sublane.
    n_steps = max(2, pl.cdiv(B, block_b))
    TB = _round_up(pl.cdiv(B, n_steps), _SUB)
    grid_b = pl.cdiv(B, TB)
    B_p = grid_b * TB

    x_p = _pad2(states, B_p, S)                                  # batch pad only
    w1_p = _pad2(w1, S, H_p).astype(jnp.bfloat16)                # bf16 MXU operands
    w2_p = _pad2(w2, H_p, H_p).astype(jnp.bfloat16)
    wm_p = _pad2(wm, H_p, A_p).astype(jnp.bfloat16)
    b1_p = _pad2(b1, 1, H_p)                                     # f32 biases
    b2_p = _pad2(b2, 1, H_p)
    bm_p = _pad2(bm, 1, A_p)

    out_bytes = jnp.dtype(mean_dtype).itemsize
    w_bytes = (S * H_p + H_p * H_p + H_p * A_p) * 2 + (2 * H_p + A_p) * 4

    # Advisory cost on real traffic (unpadded input, real flops).
    flops = 2 * B_p * (S * H + H * H + H * A)
    bytes_accessed = B_p * S * 4 + w_bytes + B_p * A_p * out_bytes

    # Scoped-VMEM budget: double-buffered x & mean tiles + resident weights.
    vmem_est = 2 * TB * S * 4 + 2 * TB * A_p * out_bytes + w_bytes
    vmem_limit = int(min(32 * 1024 * 1024,
                         max(16 * 1024 * 1024, 2 * vmem_est)))

    resident = lambda shape: pl.BlockSpec(shape, lambda i: (0, 0))

    mean_p = pl.pallas_call(
        _policy_kernel,
        out_shape=jax.ShapeDtypeStruct((B_p, A_p), mean_dtype),
        grid=(grid_b,),
        in_specs=[
            pl.BlockSpec((TB, S), lambda i: (i, 0)),   # states: batch-tiled, real lanes
            resident((S, H_p)),                        # W1 (resident in VMEM)
            resident((1, H_p)),                        # b1
            resident((H_p, H_p)),                      # W2
            resident((1, H_p)),                        # b2
            resident((H_p, A_p)),                      # W_mean
            resident((1, A_p)),                        # b_mean
        ],
        out_specs=pl.BlockSpec((TB, A_p), lambda i: (i, 0)),
        compiler_params=pltpu.CompilerParams(
            dimension_semantics=("parallel",),
            vmem_limit_bytes=vmem_limit),
        cost_estimate=pl.CostEstimate(
            flops=flops, transcendentals=0, bytes_accessed=bytes_accessed),
    )(x_p, w1_p, b1_p, w2_p, b2_p, wm_p, bm_p)

    mean = mean_p[:B, :A]
    # std = exp(log_std), broadcast over batch (matches torch Normal semantics).
    std = jnp.broadcast_to(jnp.exp(log_std).reshape(1, A), (B, A))
    return mean, std


def init_params(key, state_dim, action_dim, hidden_dim=64):
    """Deterministic synthetic init matching nn.Linear shapes (stored transposed)."""
    k1, k2, k3, k4, k5, k6 = jax.random.split(key, 6)

    def linear(kw, kb, fan_in, fan_out):
        bound = 1.0 / jnp.sqrt(fan_in)
        w = jax.random.uniform(kw, (fan_in, fan_out), jnp.float32, -bound, bound)
        b = jax.random.uniform(kb, (1, fan_out), jnp.float32, -bound, bound)
        return w, b

    w1, b1 = linear(k1, k2, state_dim, hidden_dim)
    w2, b2 = linear(k3, k4, hidden_dim, hidden_dim)
    wm, bm = linear(k5, k6, hidden_dim, action_dim)
    log_std = jnp.zeros((1, action_dim), jnp.float32)  # nn.Parameter(torch.zeros(A))
    return {"w1": w1, "b1": b1, "w2": w2, "b2": b2,
            "wm": wm, "bm": bm, "log_std": log_std}


def _reference_forward(states, p):
    h1 = jnp.maximum(states @ p["w1"] + p["b1"], 0.0)
    h2 = jnp.maximum(h1 @ p["w2"] + p["b2"], 0.0)
    mean = h2 @ p["wm"] + p["bm"]
    std = jnp.broadcast_to(jnp.exp(p["log_std"]), mean.shape)
    return mean, std


if __name__ == "__main__":
    batch, state_dim, action_dim, hidden_dim = 8, 16, 8, 64

    key = jax.random.PRNGKey(0)
    k_params, k_states = jax.random.split(key)
    params = init_params(k_params, state_dim, action_dim, hidden_dim)
    states = jax.random.normal(k_states, (batch, state_dim), jnp.float32)

    mean, std = policy_forward(states, params)
    jax.block_until_ready((mean, std))

    ref_mean, ref_std = _reference_forward(states, params)
    assert mean.shape == (batch, action_dim) and std.shape == (batch, action_dim)
    # bf16 MXU operands (f32 accumulation) -> loosened tolerance on the mean.
    assert jnp.allclose(mean, ref_mean, atol=3e-2, rtol=3e-2)
    # std is computed in f32 in the wrapper -> tight tolerance.
    assert jnp.allclose(std, ref_std, atol=1e-6, rtol=1e-6)

    print("KERNEL_OK")
</pallas_src>

<mosaic_0001>
module attributes {stable_mosaic.version = 11 : i64} {
  func.func @_policy_kernel(%arg0: i32, %arg1: memref<8x16xf32, #tpu.memory_space<vmem>>, %arg2: memref<16x128xbf16, #tpu.memory_space<vmem>>, %arg3: memref<1x128xf32, #tpu.memory_space<vmem>>, %arg4: memref<128x128xbf16, #tpu.memory_space<vmem>>, %arg5: memref<1x128xf32, #tpu.memory_space<vmem>>, %arg6: memref<128x128xbf16, #tpu.memory_space<vmem>>, %arg7: memref<1x128xf32, #tpu.memory_space<vmem>>, %arg8: memref<8x128xf32, #tpu.memory_space<vmem>>) attributes {dimension_semantics = [#tpu.dimension_semantics<parallel>], iteration_bounds = array<i64: 1>, scalar_prefetch = 0 : i64, scratch_operands = 0 : i64, tpu.core_type = #tpu.core_type<tc>, window_params = [{transform_indices = @transform_0, window_bounds = array<i64: 8, 16>}, {pipeline_mode = #tpu.pipeline_mode<synchronous>, transform_indices = @transform_1, window_bounds = array<i64: 16, 128>}, {pipeline_mode = #tpu.pipeline_mode<synchronous>, transform_indices = @transform_2, window_bounds = array<i64: 1, 128>}, {pipeline_mode = #tpu.pipeline_mode<synchronous>, transform_indices = @transform_3, window_bounds = array<i64: 128, 128>}, {pipeline_mode = #tpu.pipeline_mode<synchronous>, transform_indices = @transform_4, window_bounds = array<i64: 1, 128>}, {pipeline_mode = #tpu.pipeline_mode<synchronous>, transform_indices = @transform_5, window_bounds = array<i64: 128, 128>}, {pipeline_mode = #tpu.pipeline_mode<synchronous>, transform_indices = @transform_6, window_bounds = array<i64: 1, 128>}, {transform_indices = @transform_7, window_bounds = array<i64: 8, 128>}]} {
    %c0 = arith.constant 0 : index
    %c0_0 = arith.constant 0 : index
    %0 = vector.load %arg1[%c0, %c0_0] : memref<8x16xf32, #tpu.memory_space<vmem>>, vector<8x16xf32>
    %1 = arith.truncf %0 : vector<8x16xf32> to vector<8x16xbf16>
    %c0_1 = arith.constant 0 : index
    %c0_2 = arith.constant 0 : index
    %2 = vector.load %arg2[%c0_1, %c0_2] : memref<16x128xbf16, #tpu.memory_space<vmem>>, vector<16x128xbf16>
    %cst = arith.constant dense<0.000000e+00> : vector<8x128xf32>
    %3 = tpu.matmul %1, %2, %cst {dimension_numbers = #tpu.dot_dimension_numbers<[1], [0], [0], [1], [0, 0, 1, 1], [], []>} : vector<8x16xbf16>, vector<16x128xbf16>, vector<8x128xf32> -> vector<8x128xf32>
    %c0_3 = arith.constant 0 : index
    %c0_4 = arith.constant 0 : index
    %4 = vector.load %arg3[%c0_3, %c0_4] : memref<1x128xf32, #tpu.memory_space<vmem>>, vector<1x128xf32>
    %5 = vector.broadcast %4 : vector<1x128xf32> to vector<8x128xf32>
    %6 = arith.addf %3, %5 : vector<8x128xf32>
    %cst_5 = arith.constant 0.000000e+00 : f32
    %7 = vector.broadcast %cst_5 : f32 to vector<8x128xf32>
    %8 = arith.maximumf %6, %7 : vector<8x128xf32>
    %9 = arith.truncf %8 : vector<8x128xf32> to vector<8x128xbf16>
    %c0_6 = arith.constant 0 : index
    %c0_7 = arith.constant 0 : index
    %10 = vector.load %arg4[%c0_6, %c0_7] : memref<128x128xbf16, #tpu.memory_space<vmem>>, vector<128x128xbf16>
    %cst_8 = arith.constant dense<0.000000e+00> : vector<8x128xf32>
    %11 = tpu.matmul %9, %10, %cst_8 {dimension_numbers = #tpu.dot_dimension_numbers<[1], [0], [0], [1], [0, 0, 1, 1], [], []>} : vector<8x128xbf16>, vector<128x128xbf16>, vector<8x128xf32> -> vector<8x128xf32>
    %c0_9 = arith.constant 0 : index
    %c0_10 = arith.constant 0 : index
    %12 = vector.load %arg5[%c0_9, %c0_10] : memref<1x128xf32, #tpu.memory_space<vmem>>, vector<1x128xf32>
    %13 = vector.broadcast %12 : vector<1x128xf32> to vector<8x128xf32>
    %14 = arith.addf %11, %13 : vector<8x128xf32>
    %cst_11 = arith.constant 0.000000e+00 : f32
    %15 = vector.broadcast %cst_11 : f32 to vector<8x128xf32>
    %16 = arith.maximumf %14, %15 : vector<8x128xf32>
    %17 = arith.truncf %16 : vector<8x128xf32> to vector<8x128xbf16>
    %c0_12 = arith.constant 0 : index
    %c0_13 = arith.constant 0 : index
    %18 = vector.load %arg6[%c0_12, %c0_13] : memref<128x128xbf16, #tpu.memory_space<vmem>>, vector<128x128xbf16>
    %cst_14 = arith.constant dense<0.000000e+00> : vector<8x128xf32>
    %19 = tpu.matmul %17, %18, %cst_14 {dimension_numbers = #tpu.dot_dimension_numbers<[1], [0], [0], [1], [0, 0, 1, 1], [], []>} : vector<8x128xbf16>, vector<128x128xbf16>, vector<8x128xf32> -> vector<8x128xf32>
    %c0_15 = arith.constant 0 : index
    %c0_16 = arith.constant 0 : index
    %20 = vector.load %arg7[%c0_15, %c0_16] : memref<1x128xf32, #tpu.memory_space<vmem>>, vector<1x128xf32>
    %21 = vector.broadcast %20 : vector<1x128xf32> to vector<8x128xf32>
    %22 = arith.addf %19, %21 : vector<8x128xf32>
    %c0_17 = arith.constant 0 : index
    %c0_18 = arith.constant 0 : index
    %23 = vector.load %arg8[%c0_17, %c0_18] : memref<8x128xf32, #tpu.memory_space<vmem>>, vector<8x128xf32>
    tpu.vector_store %arg8[%c0_17, %c0_18], %22 {strides = array<i32>} : memref<8x128xf32, #tpu.memory_space<vmem>>, vector<8x128xf32>,
    return
  }
  func.func @transform_0(%arg0: i32) -> (i32, i32) {
    %c0_i32 = arith.constant 0 : i32
    %c0_i32_0 = arith.constant 0 : i32
    return %arg0, %c0_i32 : i32, i32
  }
  func.func @transform_1(%arg0: i32) -> (i32, i32) {
    %c0_i32 = arith.constant 0 : i32
    %c0_i32_0 = arith.constant 0 : i32
    %c0_i32_1 = arith.constant 0 : i32
    return %c0_i32, %c0_i32_0 : i32, i32
  }
  func.func @transform_2(%arg0: i32) -> (i32, i32) {
    %c0_i32 = arith.constant 0 : i32
    %c0_i32_0 = arith.constant 0 : i32
    %c0_i32_1 = arith.constant 0 : i32
    return %c0_i32, %c0_i32_0 : i32, i32
  }
  func.func @transform_3(%arg0: i32) -> (i32, i32) {
    %c0_i32 = arith.constant 0 : i32
    %c0_i32_0 = arith.constant 0 : i32
    %c0_i32_1 = arith.constant 0 : i32
    return %c0_i32, %c0_i32_0 : i32, i32
  }
  func.func @transform_4(%arg0: i32) -> (i32, i32) {
    %c0_i32 = arith.constant 0 : i32
    %c0_i32_0 = arith.constant 0 : i32
    %c0_i32_1 = arith.constant 0 : i32
    return %c0_i32, %c0_i32_0 : i32, i32
  }
  func.func @transform_5(%arg0: i32) -> (i32, i32) {
    %c0_i32 = arith.constant 0 : i32
    %c0_i32_0 = arith.constant 0 : i32
    %c0_i32_1 = arith.constant 0 : i32
    return %c0_i32, %c0_i32_0 : i32, i32
  }
  func.func @transform_6(%arg0: i32) -> (i32, i32) {
    %c0_i32 = arith.constant 0 : i32
    %c0_i32_0 = arith.constant 0 : i32
    %c0_i32_1 = arith.constant 0 : i32
    return %c0_i32, %c0_i32_0 : i32, i32
  }
  func.func @transform_7(%arg0: i32) -> (i32, i32) {
    %c0_i32 = arith.constant 0 : i32
    %c0_i32_0 = arith.constant 0 : i32
    return %arg0, %c0_i32 : i32, i32
  }
}

</mosaic_0001>

<bundles_post_ra>
// kernel: policy_forward.1
= control target key start
LH: loop header
LB: loop body
LE: loop exit
PB: predicated region body
PF: predicated region fallthrough
CT: control target
= control target key end

     0   :  { %v459_v1 = vmov 0.0   ;;  %vm45_vm0 = vcmask 130048   ;;  %vm460_vm1 = vmmov 0   ;;  %s588_s0 = inlined_call_operand.vmem [shape: f32[8,16], index: 0, kind: input, shape index: {}]   ;;  %s589_s1 = inlined_call_operand.vmem [shape: bf16[16,128], index: 1, kind: input, shape index: {}]   ;;  %s590_s2 = inlined_call_operand.vmem [shape: f32[1,128], index: 2, kind: input, shape index: {}]   ;;  %s591_s3 = inlined_call_operand.vmem [shape: bf16[128,128], index: 3, kind: input, shape index: {}]   ;;  %s592_s4 = inlined_call_operand.vmem [shape: f32[1,128], index: 4, kind: input, shape index: {}]   ;;  %s593_s5 = inlined_call_operand.vmem [shape: bf16[128,128], index: 5, kind: input, shape index: {}]   ;;  %s594_s6 = inlined_call_operand.vmem [shape: f32[1,128], index: 6, kind: input, shape index: {}]   ;;  %s595_s7 = inlined_call_operand.hbm [shape: f32[8,128], index: 7, kind: output, shape index: {}]  }
   0x1   :  { %v420_v0 = vld [vmem:[%s589_s1] sm:$0xff]   ;;  %371 = vmatprep.subr.bf16.mxu0 %v459_v1  ;;  %377 = vmatprep.subr.bf16.mxu1 %v459_v1  ;;  %v421_v3 = vld [vmem:[%s591_s3 + $0x38] sm:$0xff]   ;;  %v422_v5 = vld [vmem:[%s591_s3 + $0x30] sm:$0xff]  }
   0x2   :  { %v28_v2 = vld [vmem:[%s588_s0] sm:$0xff]  ;;  %372 = vmatpush3.bf16.msra.mxu0 %v420_v0  ;;  %373 = vmatprep.mubr.msk.bf16.mxu0 %vm460_vm1, %v459_v1  ;;  %v423_v6 = vld [vmem:[%s591_s3 + $0x28] sm:$0xff]  }
   0x3   :  { %v29_v4 = vpack.c.bf16 %v28_v2, %v28_v2  ;;  %378 = vmatpush3.bf16.msra.mxu1 %v421_v3  ;;  %393 = vmatprep.mubr.msk.bf16.mxu1 %vm460_vm1, %v459_v1  ;;  %v424_v7 = vld [vmem:[%s591_s3 + $0x20] sm:$0xff]  }
   0x4   :  { %379 = vmatprep.subr.bf16.mxu1 %v459_v1  ;;  %397 = vmatprep.subr.bf16.mxu0 %v459_v1 }
   0x5   :  { %374 = vmatmul.mubr.msk.bf16.vlgmr.msra.gmra.mxu0 %vm45_vm0, %v29_v4 }
   0x6   :  { %413 = vmatprep.mubr.msk.bf16.mxu0 %vm460_vm1, %v459_v1 }
   0x7   :  { %380 = vmatpush3.bf16.msra.mxu1 %v422_v5 }
   0x8   :  { %381 = vmatprep.subr.bf16.mxu1 %v459_v1 }
   0xb   :  { %382 = vmatpush3.bf16.msra.mxu1 %v423_v6 }
   0xc   :  { %383 = vmatprep.subr.bf16.mxu1 %v459_v1 }
   0xd   :  { %12 = vsyncpa [#allocation3], 0  ;;  %v425_v8 = vld [vmem:[%s591_s3 + $0x18] sm:$0xff]   ;;  %v426_v9 = vld [vmem:[%s591_s3 + $0x10] sm:$0xff]   ;;  %s461_s14 = smov [#allocation2]  }
   0xe   :  { %v427_v10 = vld [vmem:[%s591_s3 + $0x8] sm:$0xff]   ;;  %v428_v11 = vld [vmem:[%s591_s3] sm:$0xff]   ;;  %v429_v12 = vld [vmem:[%s593_s5 + $0x38] sm:$0xff]   ;;  %s322_s15 = sshll.u32 %s461_s14, 4  ;;  %s323_s15 = int_to_ptr.vmem [resolvable:$true] %s322_s15 }
   0xf   :  { %384 = vmatpush3.bf16.msra.mxu1 %v424_v7  ;;  %398 = vmatpush3.bf16.msra.mxu0 %v429_v12  ;;  %v430_v13 = vld [vmem:[%s593_s5 + $0x30] sm:$0xff]   ;;  %v431_v14 = vld [vmem:[%s593_s5 + $0x28] sm:$0xff]   ;;  %v432_v15 = vld [vmem:[%s593_s5 + $0x20] sm:$0xff]   ;;  %p442_p1 = scmp.lt.s32.totalorder %s323_s15, %s323_s15 }
  0x10   :  { %385 = vmatprep.subr.bf16.mxu1 %v459_v1  ;;  %399 = vmatprep.subr.bf16.mxu0 %v459_v1  ;;  %v433_v16 = vld [vmem:[%s593_s5 + $0x18] sm:$0xff]   ;;  %v434_v17 = vld [vmem:[%s593_s5 + $0x10] sm:$0xff]   ;;  %v330_v18 = vld [vmem:[%s590_s2] ss:$0 sm:$0xff] }
  0x11   :  { %v435_v26 = vld [vmem:[%s593_s5 + $0x8] sm:$0xff]   ;;  %v436_v27 = vld [vmem:[%s593_s5] sm:$0xff]  }
  0x12   :  { %v333_v28 = vld [vmem:[%s592_s4] ss:$0 sm:$0xff]  ;;  %s437_s4 = scalar_lea.vmem %s323_s15, 128 }
  0x13   :  { %386 = vmatpush3.bf16.msra.mxu1 %v425_v8  ;;  %400 = vmatpush3.bf16.msra.mxu0 %v430_v13  ;;  %v342_v36 = vld [vmem:[%s594_s6] ss:$0 sm:$0xff]  ;;  %p438_p0 = scmp.ne.s32.totalorder %s323_s15, %s437_s4  ;;  %p443_p2 = scmp.lt.s32.totalorder %s437_s4, %s437_s4 }
  0x14   :  { %387 = vmatprep.subr.bf16.mxu1 %v459_v1  ;;  %401 = vmatprep.subr.bf16.mxu0 %v459_v1 }
  0x15   :  { %p444_p3 = por %p443_p2, %p442_p1 }
  0x17   :  { %388 = vmatpush3.bf16.msra.mxu1 %v426_v9  ;;  %402 = vmatpush3.bf16.msra.mxu0 %v431_v14  ;;  %p445_p4 = pnand %p444_p3, %p438_p0 }
  0x18   :  { %389 = vmatprep.subr.bf16.mxu1 %v459_v1  ;;  %403 = vmatprep.subr.bf16.mxu0 %v459_v1 }
  0x1b   :  { %390 = vmatpush3.bf16.msra.mxu1 %v427_v10  ;;  %404 = vmatpush3.bf16.msra.mxu0 %v432_v15 }
  0x1c   :  { %391 = vmatprep.subr.bf16.mxu1 %v459_v1  ;;  %405 = vmatprep.subr.bf16.mxu0 %v459_v1 }
  0x1f   :  { %392 = vmatpush3.bf16.msra.mxu1 %v428_v11  ;;  %406 = vmatpush3.bf16.msra.mxu0 %v433_v16 }
  0x20   :  { %407 = vmatprep.subr.bf16.mxu0 %v459_v1 }
  0x23   :  { %408 = vmatpush3.bf16.msra.mxu0 %v434_v17 }
  0x24   :  { %409 = vmatprep.subr.bf16.mxu0 %v459_v1 }
  0x27   :  { %410 = vmatpush3.bf16.msra.mxu0 %v435_v26 }
  0x28   :  { %411 = vmatprep.subr.bf16.mxu0 %v459_v1 }
  0x2b   :  { %412 = vmatpush3.bf16.msra.mxu0 %v436_v27 }
  0xc5   :  { %v83_v19 = vpop.f32.mrf.mxu0 }
  0xc6   :  { %v84_v20 = vadd.f32 %v330_v18, %v83_v19 }
  0xc7   :  { %v375_v21 = vpop.f32.mrf.mxu0 }
  0xc8   :  { %v89_v22 = vmax.f32 %v84_v20, 0.0 }
  0xc9   :  { %v86_v23 = vpop.f32.mrf.mxu0 }
  0xca   :  { %v90_v24 = vpack.c.bf16 %v89_v22, %v89_v22 }
  0xcb   :  { %v376_v25 = vpop.f32.mrf.mxu0 }
  0xcc   :  { %394 = vmatmul.mubr.bf16.vlgmr.msra.gmra.mxu1 %v90_v24 }
 0x18c   :  { %v196_v29 = vpop.f32.mrf.mxu1 }
 0x18d   :  { %v197_v30 = vadd.f32 %v333_v28, %v196_v29 }
 0x18e   :  { %v395_v31 = vpop.f32.mrf.mxu1 }
 0x18f   :  { %v202_v32 = vmax.f32 %v197_v30, 0.0 }
 0x190   :  { %v199_v33 = vpop.f32.mrf.mxu1 }
 0x191   :  { %v203_v34 = vpack.c.bf16 %v202_v32, %v202_v32 }
 0x192   :  { %v396_v35 = vpop.f32.mrf.mxu1 }
 0x193   :  { %414 = vmatmul.mubr.bf16.vlgmr.msra.gmra.mxu0 %v203_v34 }
 0x253   :  { %v309_v37 = vpop.f32.mrf.mxu0 }
 0x254   :  { %v310_v38 = vadd.f32 %v342_v36, %v309_v37 }
 0x255   :  { %v415_v39 = vpop.f32.mrf.mxu0 }
 0x256   :  { %315 = vst [vmem:[#allocation2] sm:$0xff] %v310_v38 }
 0x257   :  { %v312_v40 = vpop.f32.mrf.mxu0 }
 0x258   :  { %448 = shalt.err (!%p445_p4)
}
 0x259   :  { %325 = dma.vmem_to_hbm [thread:$0]  %s323_s15, 128, %s595_s7, [#allocation3]   ;;  %v416_v41 = vpop.f32.mrf.mxu0 }
 0x25a   :  { %457 = dma.done.wait [#allocation3], 128  }
 0x25b   :  { %458 = vsyncadd [#allocation3], 4294967168 }
 0x25c   :  { %329 = vsyncpa [#allocation3], 1 }

</bundles_post_ra>
